<compile_context>
chip_gen: v5e
topology: v5e:2x2
jax: 0.10.0
libtpu: 0.0.40
codegen_flags: <defaults>
</compile_context>

<pallas_src>
import functools

import jax
import jax.numpy as jnp
from jax.experimental import pallas as pl
from jax.experimental.pallas import tpu as pltpu

_LANES = 128
_SUBLANES = 8


# --------------------------- shared element-wise math -------------------------

def _concrete_from_neglogs(p_f32, la, lb, *, use_approx_recip):
    """Z given la = -log(u_a), lb = -log(u_b).

    no = p*exp(-log(la))/tau = p/(tau*la);  de = no + (1-p)/(tau*lb)
    Z  = no/de = p*lb / (p*lb + (1-p)*la)        (tau cancels exactly)
    """
    num = p_f32 * lb
    den = num + (1.0 - p_f32) * la
    if use_approx_recip:
        return num * pl.reciprocal(den, approx=True)   # EUP vrcp, TPU path only
    return num / den


def _uniform_open01(shape):
    """Uniform in the open interval (0,1) from the TPU hardware PRNG."""
    bits = pltpu.prng_random_bits(shape)
    if bits.dtype != jnp.uint32:
        bits = pltpu.bitcast(bits, jnp.uint32)
    # Exponent-bitfield trick: mantissa bits with exponent of 1.0 -> [1, 2).
    f = pltpu.bitcast((bits >> 9) | jnp.uint32(0x3F800000), jnp.float32)
    # Subtract largest f32 < 1 (exact, Sterbenz) -> [2^-24, 1 - 2^-24]: never 0/1.
    return f - jnp.float32(1.0 - 2.0 ** -24)


# --------------------------------- kernels ------------------------------------

def _sample_kernel_hwprng(seed_ref, probs_ref, out_ref):
    # seed_ref: SMEM (1,) int32 scalar prefetch.  Independent stream per block.
    pltpu.prng_seed(seed_ref[0], pl.program_id(0))
    shape = probs_ref.shape
    la = -jnp.log(_uniform_open01(shape))
    lb = -jnp.log(_uniform_open01(shape))
    p = probs_ref[...].astype(jnp.float32)
    z = _concrete_from_neglogs(p, la, lb, use_approx_recip=True)
    out_ref[...] = z.astype(out_ref.dtype)


def _fixed_noise_kernel(probs_ref, ua_ref, ub_ref, out_ref, *, use_approx_recip):
    p = probs_ref[...].astype(jnp.float32)
    la = -jnp.log(ua_ref[...])
    lb = -jnp.log(ub_ref[...])
    z = _concrete_from_neglogs(p, la, lb, use_approx_recip=use_approx_recip)
    out_ref[...] = z.astype(out_ref.dtype)


# ----------------------------- tiling / packing --------------------------------

def _tiling(n, max_block_rows):
    rows = pl.cdiv(n, _LANES)
    rows8 = pl.cdiv(rows, _SUBLANES) * _SUBLANES        # sublane-aligned rows
    block_rows = max(_SUBLANES, min(max_block_rows, rows8))
    # Ensure >= 2 grid steps when possible so the "parallel" axis can shard
    # across v7x's two TensorCores (no-op cost on v5e/v6e).
    if rows8 >= 2 * _SUBLANES and block_rows > rows8 // 2:
        block_rows = max(_SUBLANES, (rows8 // 2) // _SUBLANES * _SUBLANES)
    rows_pad = pl.cdiv(rows8, block_rows) * block_rows
    return rows_pad, block_rows


def _pack_2d(flat, rows_pad, fill):
    n = flat.shape[0]
    total = rows_pad * _LANES
    if total != n:                                       # only pad when ragged
        flat = jnp.pad(flat, (0, total - n), constant_values=fill)
    return flat.reshape(rows_pad, _LANES)


def _unpack(out2d, n, shape):
    if out2d.size == n:
        return out2d.reshape(shape)
    return out2d.reshape(-1)[:n].reshape(shape)


def _fixed_noise_call(p2d, a2d, b2d, block_rows, out_dtype):
    rows_pad = p2d.shape[0]
    spec = pl.BlockSpec((block_rows, _LANES), lambda i: (i, 0))
    return pl.pallas_call(
        functools.partial(_fixed_noise_kernel, use_approx_recip=False),
        out_shape=jax.ShapeDtypeStruct((rows_pad, _LANES), out_dtype),
        grid=(rows_pad // block_rows,),
        in_specs=[spec, spec, spec],
        out_specs=spec,
    )(p2d, a2d, b2d)


# --------------------------------- wrappers ------------------------------------

def sample_concrete(probs, tau, seed, *, max_block_rows=2048):
    """Z = Sample_Concrete(tau)(probs).

    tau cancels algebraically in no/de (same 1/tau factor in both), so it has
    no effect on the result — kept only for API parity with the PyTorch module.
    Default block (2048, 128) f32 = 1 MiB/tile, ~4 MiB double-buffered: safe on
    v5e/v6e (128 MiB VMEM) and v7x (32 MiB scoped default).
    """
    del tau
    shape, dtype = probs.shape, probs.dtype
    n = probs.size
    rows_pad, block_rows = _tiling(n, max_block_rows)
    x2d = _pack_2d(probs.reshape(-1), rows_pad, fill=0)   # native dtype, no cast

    if jax.default_backend() == "tpu":
        seed_arr = jnp.asarray([seed], dtype=jnp.int32)
        out2d = pl.pallas_call(
            _sample_kernel_hwprng,
            out_shape=jax.ShapeDtypeStruct((rows_pad, _LANES), dtype),
            grid_spec=pltpu.PrefetchScalarGridSpec(
                num_scalar_prefetch=1,
                grid=(rows_pad // block_rows,),
                in_specs=[pl.BlockSpec((block_rows, _LANES),
                                       lambda i, seed: (i, 0))],
                out_specs=pl.BlockSpec((block_rows, _LANES),
                                       lambda i, seed: (i, 0)),
            ),
            compiler_params=pltpu.CompilerParams(
                dimension_semantics=("parallel",)),
        )(seed_arr, x2d)
    else:
        # Portable fallback (CPU / interpret): the TPU hardware PRNG has no
        # lowering off-TPU, so draw the uniforms with jax.random and feed them
        # into the same fused element-wise kernel.
        ka, kb = jax.random.split(jax.random.PRNGKey(seed))
        ua = jax.random.uniform(ka, (rows_pad, _LANES), jnp.float32,
                                minval=1e-7, maxval=1.0 - 1e-7)
        ub = jax.random.uniform(kb, (rows_pad, _LANES), jnp.float32,
                                minval=1e-7, maxval=1.0 - 1e-7)
        out2d = _fixed_noise_call(x2d, ua, ub, block_rows, dtype)

    return _unpack(out2d, n, shape)


def sample_concrete_fixed_noise(probs, ua, ub, tau, *, max_block_rows=2048):
    """Same math with host-supplied uniforms (for exact correctness checking)."""
    del tau
    shape, dtype = probs.shape, probs.dtype
    n = probs.size
    rows_pad, block_rows = _tiling(n, max_block_rows)
    p2d = _pack_2d(probs.reshape(-1), rows_pad, fill=0)
    # Pad the uniforms with 0.5 so padded lanes never hit log(0).
    a2d = _pack_2d(ua.reshape(-1).astype(jnp.float32), rows_pad, fill=0.5)
    b2d = _pack_2d(ub.reshape(-1).astype(jnp.float32), rows_pad, fill=0.5)
    out2d = _fixed_noise_call(p2d, a2d, b2d, block_rows, dtype)
    return _unpack(out2d, n, shape)


# ------------------------------ pure-JAX reference ------------------------------

def sample_concrete_reference(probs, ua, ub, tau):
    # Verbatim PyTorch formula.
    ga = -jnp.log(-jnp.log(ua))
    gb = -jnp.log(-jnp.log(ub))
    no = probs * jnp.exp(ga) / tau
    de = no + (1.0 - probs) * jnp.exp(gb) / tau
    return no / de


# ------------------------------------ main --------------------------------------

if __name__ == "__main__":
    key = jax.random.PRNGKey(0)
    k_p, k_a, k_b = jax.random.split(key, 3)
    tau = 0.5
    # Shape consistent with the mnist selector whose probabilities this module
    # samples: (batch, 16, 1) per-patch selection probabilities.
    probs = jax.random.uniform(k_p, (64, 16, 1), jnp.float32,
                               minval=0.01, maxval=0.99)

    # 1) Main fused kernel (hardware PRNG on TPU, portable fallback elsewhere).
    fwd = jax.jit(functools.partial(sample_concrete, tau=tau, seed=42))
    z = fwd(probs)
    jax.block_until_ready(z)
    assert z.shape == probs.shape, z.shape
    assert bool(jnp.all(jnp.isfinite(z)))
    assert bool(jnp.all((z >= 0.0) & (z <= 1.0)))

    # 2) Math check: identical kernel body with host-supplied noise vs. the
    #    verbatim PyTorch formula in pure JAX.
    ua = jax.random.uniform(k_a, probs.shape, jnp.float32,
                            minval=1e-3, maxval=1.0 - 1e-3)
    ub = jax.random.uniform(k_b, probs.shape, jnp.float32,
                            minval=1e-3, maxval=1.0 - 1e-3)
    z_fix = jax.jit(functools.partial(sample_concrete_fixed_noise, tau=tau))(
        probs, ua, ub)
    jax.block_until_ready(z_fix)
    z_ref = sample_concrete_reference(probs, ua, ub, tau)
    err = float(jnp.max(jnp.abs(z_fix - z_ref)))
    assert err < 1e-4, err

    print("KERNEL_OK")
</pallas_src>

<mosaic_0001>
module attributes {stable_mosaic.version = 11 : i64} {
  func.func @_fixed_noise_kernel(%arg0: i32, %arg1: memref<8x128xf32, #tpu.memory_space<vmem>>, %arg2: memref<8x128xf32, #tpu.memory_space<vmem>>, %arg3: memref<8x128xf32, #tpu.memory_space<vmem>>, %arg4: memref<8x128xf32, #tpu.memory_space<vmem>>) attributes {dimension_semantics = [#tpu.dimension_semantics<arbitrary>], iteration_bounds = array<i64: 1>, scalar_prefetch = 0 : i64, scratch_operands = 0 : i64, tpu.core_type = #tpu.core_type<tc>, window_params = [{transform_indices = @transform_0, window_bounds = array<i64: 8, 128>}, {transform_indices = @transform_1, window_bounds = array<i64: 8, 128>}, {transform_indices = @transform_2, window_bounds = array<i64: 8, 128>}, {transform_indices = @transform_3, window_bounds = array<i64: 8, 128>}]} {
    %c0 = arith.constant 0 : index
    %c0_0 = arith.constant 0 : index
    %0 = vector.load %arg1[%c0, %c0_0] : memref<8x128xf32, #tpu.memory_space<vmem>>, vector<8x128xf32>
    %c0_1 = arith.constant 0 : index
    %c0_2 = arith.constant 0 : index
    %1 = vector.load %arg2[%c0_1, %c0_2] : memref<8x128xf32, #tpu.memory_space<vmem>>, vector<8x128xf32>
    %2 = math.log %1 : vector<8x128xf32>
    %cst = arith.constant 0.000000e+00 : f32
    %3 = vector.broadcast %cst : f32 to vector<8x128xf32>
    %4 = arith.subf %3, %2 : vector<8x128xf32>
    %c0_3 = arith.constant 0 : index
    %c0_4 = arith.constant 0 : index
    %5 = vector.load %arg3[%c0_3, %c0_4] : memref<8x128xf32, #tpu.memory_space<vmem>>, vector<8x128xf32>
    %6 = math.log %5 : vector<8x128xf32>
    %cst_5 = arith.constant 0.000000e+00 : f32
    %7 = vector.broadcast %cst_5 : f32 to vector<8x128xf32>
    %8 = arith.subf %7, %6 : vector<8x128xf32>
    %9 = arith.mulf %0, %8 : vector<8x128xf32>
    %cst_6 = arith.constant 1.000000e+00 : f32
    %10 = vector.broadcast %cst_6 : f32 to vector<8x128xf32>
    %11 = arith.subf %10, %0 : vector<8x128xf32>
    %12 = arith.mulf %11, %4 : vector<8x128xf32>
    %13 = arith.addf %9, %12 : vector<8x128xf32>
    %14 = arith.divf %9, %13 : vector<8x128xf32>
    %c0_7 = arith.constant 0 : index
    %c0_8 = arith.constant 0 : index
    %15 = vector.load %arg4[%c0_7, %c0_8] : memref<8x128xf32, #tpu.memory_space<vmem>>, vector<8x128xf32>
    tpu.vector_store %arg4[%c0_7, %c0_8], %14 {strides = array<i32>} : memref<8x128xf32, #tpu.memory_space<vmem>>, vector<8x128xf32>,
    return
  }
  func.func @transform_0(%arg0: i32) -> (i32, i32) {
    %c0_i32 = arith.constant 0 : i32
    %c0_i32_0 = arith.constant 0 : i32
    return %arg0, %c0_i32 : i32, i32
  }
  func.func @transform_1(%arg0: i32) -> (i32, i32) {
    %c0_i32 = arith.constant 0 : i32
    %c0_i32_0 = arith.constant 0 : i32
    return %arg0, %c0_i32 : i32, i32
  }
  func.func @transform_2(%arg0: i32) -> (i32, i32) {
    %c0_i32 = arith.constant 0 : i32
    %c0_i32_0 = arith.constant 0 : i32
    return %arg0, %c0_i32 : i32, i32
  }
  func.func @transform_3(%arg0: i32) -> (i32, i32) {
    %c0_i32 = arith.constant 0 : i32
    %c0_i32_0 = arith.constant 0 : i32
    return %arg0, %c0_i32 : i32, i32
  }
}

</mosaic_0001>

<bundles_post_ra>
// kernel: sample_concrete.3
= control target key start
LH: loop header
LB: loop body
LE: loop exit
PB: predicated region body
PF: predicated region fallthrough
CT: control target
= control target key end

     0   :  { %s85_s1 = inlined_call_operand.vmem [shape: f32[8,128], index: 1, kind: input, shape index: {}]   ;;  %s86_s2 = inlined_call_operand.vmem [shape: f32[8,128], index: 2, kind: input, shape index: {}]   ;;  %s87_s0 = inlined_call_operand.vmem [shape: f32[8,128], index: 0, kind: input, shape index: {}]   ;;  %s88_s3 = inlined_call_operand.vmem [shape: f32[8,128], index: 3, kind: output, shape index: {}]  }
   0x1   :  { %v15_v0 = vld [vmem:[%s85_s1] sm:$0xff] }
   0x2   :  { %v19_v1 = vld [vmem:[%s86_s2] sm:$0xff]  ;;  %47 = vlog2.f32 %v15_v0 }
   0x3   :  { %49 = vlog2.f32 %v19_v1  ;;  %v14_v2 = vld [vmem:[%s87_s0] sm:$0xff] }
   0x4   :  { %v24_v6 = vsub.f32 1.0, %v14_v2 }
   0x8   :  { %v48_v3 = vpop.eup %47 }
   0x9   :  { %v50_v4 = vpop.eup %49  ;;  %v17_v5 = vmul.f32 0.6931472, %v48_v3 }
   0xa   :  { %v21_v7 = vmul.f32 0.6931472, %v50_v4 }
   0xb   :  { %v18_v8 = vsub.f32 0.0, %v17_v5 }
   0xc   :  { %v22_v9 = vsub.f32 0.0, %v21_v7 }
   0xd   :  { %v25_v10 = vmul.f32 %v24_v6, %v18_v8 }
   0xe   :  { %v23_v11 = vmul.f32 %v22_v9, %v14_v2 }
  0x10   :  { %v26_v12 = vadd.f32 %v25_v10, %v23_v11 }
  0x12   :  { %51 = vrcp.f32 %v26_v12  ;;  %v38_v15 = vand.u32 2147483648, %v26_v12  ;;  %vm32_vm0 = vweird.f32 %v26_v12  ;;  %v36_v17 = vand.u32 2147483647, %v26_v12 }
  0x14   :  { %v39_v19 = vor.u32 1.1754944e-38, %v38_v15  ;;  %vm37_vm3 = vcmp.eq.f32.partialorder %v36_v17, 8.507059e+37 }
  0x18   :  { %v52_v13 = vpop.eup %51 }
  0x19   :  { %v28_v14 = vmul.f32 %v52_v13, %v26_v12  ;;  %vm33_vm1 = vweird.f32 %v52_v13 }
  0x1a   :  { %vm34_vm2 = vmor %vm32_vm0, %vm33_vm1 }
  0x1b   :  { %v29_v16 = vsub.f32 1.0, %v28_v14 }
  0x1d   :  { %v30_v18 = vmul.f32 %v52_v13, %v29_v16 }
  0x1f   :  { %v31_v20 = vadd.f32 %v52_v13, %v30_v18 }
  0x21   :  { %v35_v21 = vsel %vm34_vm2, %v52_v13, %v31_v20 }
  0x22   :  { %v40_v22 = vsel %vm37_vm3, %v39_v19, %v35_v21 }
  0x23   :  { %v41_v23 = vmul.f32 %v40_v22, %v23_v11 }
  0x25   :  { %42 = vst [vmem:[%s88_s3] sm:$0xff] %v41_v23 }

</bundles_post_ra>
